<compile_context>
chip_gen: v7x
topology: tpu7x:2x2x1
jax: 0.10.0
libtpu: 0.0.40
codegen_flags: <defaults>
</compile_context>

<pallas_src>
import jax
import jax.numpy as jnp
from jax.experimental import pallas as pl
from jax.experimental.pallas import tpu as pltpu


def _tanh_kernel(s_ref, o_ref):
    # Compute in f32; tanh goes to the EUP slot and equals the module's
    # formula exactly (without an inf intermediate from exp(2s)).
    s = s_ref[...].astype(jnp.float32)
    o_ref[...] = jnp.tanh(s).astype(o_ref.dtype)


_LANE_CANDIDATES = (4096, 2048, 1024, 512, 256, 128)


def tanh_forward(s, *, target_block_bytes=2 * 1024 * 1024):
    """Elementwise Tanh forward matching the reference module's semantics."""
    orig_shape = s.shape
    dtype = s.dtype
    n = s.size
    if n == 0:
        return s

    itemsize = s.dtype.itemsize
    flat = s.reshape(-1)  # free for contiguous arrays

    # --- Tiny inputs: one full-array block, no grid machinery needed. ------
    if n < 8 * 128:
        out = pl.pallas_call(
            _tanh_kernel,
            out_shape=jax.ShapeDtypeStruct((1, n), dtype),
        )(flat.reshape(1, n))
        return out.reshape(orig_shape)

    # --- Pick the widest lane dim that divides n: reshape is then free -----
    lanes = next((l for l in _LANE_CANDIDATES if n % l == 0), None)
    padded = False
    if lanes is None:
        # Awkward size: minimal padding (< 128 extra elements).
        # TODO(synk): could instead run a second tiny pallas_call on the
        # remainder to avoid the pad + final slice copy.
        lanes = 128
        n_pad = pl.cdiv(n, lanes) * lanes
        flat = jnp.pad(flat, (0, n_pad - n))
        padded = True
        n_rows_total = n_pad // lanes
    else:
        n_rows_total = n // lanes

    slab = flat.reshape(n_rows_total, lanes)

    # ~2 MiB blocks; in+out double-buffered -> 4x block = 8 MiB of VMEM,
    # within every generation's default scoped-VMEM limit.
    tile_rows = max(8, target_block_bytes // (lanes * itemsize))
    tile_rows = min(tile_rows, n_rows_total)
    if n_rows_total >= 8:
        tile_rows = max(8, (tile_rows // 8) * 8)

    grid = (pl.cdiv(n_rows_total, tile_rows),)

    out = pl.pallas_call(
        _tanh_kernel,
        out_shape=jax.ShapeDtypeStruct(slab.shape, dtype),
        grid_spec=pltpu.PrefetchScalarGridSpec(
            num_scalar_prefetch=0,
            grid=grid,
            in_specs=[pl.BlockSpec((tile_rows, lanes), lambda i: (i, 0))],
            out_specs=pl.BlockSpec((tile_rows, lanes), lambda i: (i, 0)),
        ),
        compiler_params=pltpu.CompilerParams(
            dimension_semantics=("parallel",),
        ),
        cost_estimate=pl.CostEstimate(
            flops=2 * n,
            transcendentals=n,
            bytes_accessed=2 * n * itemsize,
        ),
    )(slab)

    if padded:
        out = out.reshape(-1)[:n]
    return out.reshape(orig_shape)


if __name__ == "__main__":
    key = jax.random.PRNGKey(0)

    # "FloatTensor of size m (m: number of units)" -> small batches of units.
    x_small = jax.random.normal(key, (8, 32), dtype=jnp.float32)          # tiny path
    x_wide = jax.random.normal(jax.random.fold_in(key, 1), (64, 128),
                               dtype=jnp.float32)                          # tiled path
    x_odd = jax.random.normal(jax.random.fold_in(key, 2), (9, 130),
                              dtype=jnp.float32)                           # padded fallback

    for x in (x_small, x_wide, x_odd):
        y = tanh_forward(x)
        jax.block_until_ready(y)

        # Reference: the module's exact formula (== tanh) in plain JAX.
        y_ref = 1.0 - 2.0 / (1.0 + jnp.exp(2.0 * x))
        assert y.shape == x.shape and y.dtype == x.dtype
        assert jnp.allclose(y, y_ref, atol=1e-6, rtol=1e-5), (
            float(jnp.max(jnp.abs(y - y_ref))))

    print("KERNEL_OK")
</pallas_src>

<mosaic_0001>
module attributes {stable_mosaic.version = 11 : i64} {
  func.func @_tanh_kernel(%arg0: memref<1x256xf32, #tpu.memory_space<vmem>>, %arg1: memref<1x256xf32, #tpu.memory_space<vmem>>) attributes {dimension_semantics = [], scalar_prefetch = 0 : i64, scratch_operands = 0 : i64, tpu.core_type = #tpu.core_type<tc>} {
    %c0 = arith.constant 0 : index
    %c0_0 = arith.constant 0 : index
    %0 = vector.load %arg0[%c0, %c0_0] : memref<1x256xf32, #tpu.memory_space<vmem>>, vector<1x256xf32>
    %1 = math.tanh %0 : vector<1x256xf32>
    %c0_1 = arith.constant 0 : index
    %c0_2 = arith.constant 0 : index
    %2 = vector.load %arg1[%c0_1, %c0_2] : memref<1x256xf32, #tpu.memory_space<vmem>>, vector<1x256xf32>
    tpu.vector_store %arg1[%c0_1, %c0_2], %1 {strides = array<i32>} : memref<1x256xf32, #tpu.memory_space<vmem>>, vector<1x256xf32>,
    return
  }
}

</mosaic_0001>

<bundles_post_ra>
// kernel: tpu_custom_call.1
= control target key start
LH: loop header
LB: loop body
LE: loop exit
PB: predicated region body
PF: predicated region fallthrough
CT: control target
= control target key end

     0   :  { %6 = vsyncpa [#allocation3], 0  ;;  %s131_s0 = inlined_call_operand.hbm [shape: f32[1,256], index: 0, kind: input, shape index: {}]   ;;  %s132_s1 = inlined_call_operand.hbm [shape: f32[1,256], index: 1, kind: output, shape index: {}]  }
   0x1   :  { %7 = vsyncpa [#allocation4], 0  ;;  %s95_s6 = smov [#allocation2]   ;;  %s47_s10 = scalar_lea.hbm %s131_s0, 32 }
   0x2   :  { %s14_s7 = sshll.u32 %s95_s6, 4  ;;  %p48_p0 = scmp.ne.s32.totalorder %s131_s0, %s47_s10  ;;  %s15_s7 = int_to_ptr.vmem [resolvable:$true] %s14_s7 }
   0x3   :  { %p51_p1 = scmp.lt.u32.totalorder %s47_s10, %s131_s0 }
   0x5   :  { %p53_p2 = pnand %p51_p1, %p48_p0 }
   0x7   :  { %56 = shalt.err (!%p53_p2)
}
   0x8   :  { %s57_s15 = scalar_lea.vmem %s15_s7, 32  ;;  %p62_p4 = scmp.lt.s32.totalorder %s15_s7, %s15_s7 }
   0x9   :  { %p58_p3 = scmp.ne.s32.totalorder %s15_s7, %s57_s15  ;;  %p63_p5 = scmp.lt.s32.totalorder %s57_s15, %s57_s15 }
   0xb   :  { %p64_p6 = por %p63_p5, %p62_p4 }
   0xd   :  { %p65_p7 = pnand %p64_p6, %p58_p3 }
   0xf   :  { %68 = shalt.err (!%p65_p7)
}
  0x10   :  { %17 = dma.hbm_to_vmem [thread:$0]  %s131_s0, 32, %s15_s7, [#allocation3]  }
  0x11   :  { %91 = dma.done.wait [#allocation3], 32  }
  0x12   :  { %92 = vsyncadd [#allocation3], 4294967264  ;;  %v21_v0 = vld [vmem:[#allocation2] sm:$0x3]  ;;  %v23_v1 = vlaneseq  ;;  %s96_s18 = smov [#allocation5]  }
  0x13   :  { %45 = vtanh.f32 %v21_v0  ;;  %s34_s19 = sshll.u32 %s96_s18, 4  ;;  %s35_s19 = int_to_ptr.vmem [resolvable:$true] %s34_s19 }
  0x14   :  { %vm25_vm0 = vcmp.lt.s32.totalorder %v23_v1, 256  ;;  %s69_s20 = scalar_lea.vmem %s35_s19, 32  ;;  %p74_p9 = scmp.lt.s32.totalorder %s35_s19, %s35_s19 }
  0x15   :  { %p70_p8 = scmp.ne.s32.totalorder %s35_s19, %s69_s20  ;;  %p75_p10 = scmp.lt.s32.totalorder %s69_s20, %s69_s20 }
  0x17   :  { %p76_p11 = por %p75_p10, %p74_p9 }
  0x19   :  { %p77_p12 = pnand %p76_p11, %p70_p8 }
  0x1d   :  { %v46_v2 = vpop.eup %45 }
  0x1e   :  { %27 = vst.msk [vmem:[#allocation5] sm:$0x3] %vm25_vm0, %v46_v2 }
  0x1f   :  { %80 = shalt.err (!%p77_p12)
}
  0x20   :  { %s81_s22 = scalar_lea.hbm %s132_s1, 32 }
  0x21   :  { %p82_p13 = scmp.ne.s32.totalorder %s132_s1, %s81_s22  ;;  %p85_p0 = scmp.lt.u32.totalorder %s81_s22, %s132_s1 }
  0x23   :  { %p87_p1 = pnand %p85_p0, %p82_p13 }
  0x25   :  { %90 = shalt.err (!%p87_p1)
}
  0x26   :  { %37 = dma.vmem_to_hbm [thread:$0]  %s35_s19, 32, %s132_s1, [#allocation4]  }
  0x27   :  { %93 = dma.done.wait [#allocation4], 32  }
  0x28   :  { %94 = vsyncadd [#allocation4], 4294967264 }
  0x29   :  { %41 = vsyncpa [#allocation3], 1 }
  0x2a   :  { %42 = vsyncpa [#allocation4], 1 }

</bundles_post_ra>
